<compile_context>
chip_gen: v7x
topology: tpu7x:2x2x1
jax: 0.10.0
libtpu: 0.0.40
codegen_flags: <defaults>
</compile_context>

<pallas_src>
import functools

import jax
import jax.numpy as jnp
from jax.experimental import pallas as pl
from jax.experimental.pallas import tpu as pltpu


def _round_up(x, m):
    return (x + m - 1) // m * m


def _default_n_splits():
    """Even 2-way batch split on v7x (2 TensorCores/chip); single tile elsewhere."""
    try:
        kind = jax.devices()[0].device_kind.lower()
    except Exception:
        return 1
    return 2 if "v7" in kind else 1


def _make_decoder_kernel(n_layers, compute_dtype):
    """logmap0 -> (Linear+ReLU)*(n_layers-1) -> Linear on one batch tile per grid step."""

    def kernel(*refs):
        x_ref = refs[0]
        w_refs = refs[1:1 + n_layers]
        b_refs = refs[1 + n_layers:1 + 2 * n_layers]
        out_ref = refs[1 + 2 * n_layers]

        x = x_ref[...].astype(jnp.float32)

        # --- Poincare-ball logmap0 (c = 1): arctanh(||x||) * x / ||x||.
        sq_norm = jnp.sum(x * x, axis=-1, keepdims=True)
        norm = jnp.sqrt(sq_norm + 1e-15)
        norm_c = jnp.clip(norm, 1e-7, 1.0 - 1e-5)
        # arctanh(y) = 0.5*log((1+y)/(1-y)); divides go through pl.reciprocal (EUP).
        atanh = 0.5 * jnp.log((1.0 + norm_c) *
                              pl.reciprocal(1.0 - norm_c, approx=False))
        h = (x * (atanh * pl.reciprocal(norm_c, approx=False))).astype(compute_dtype)

        # --- MLP stack: [Linear -> ReLU -> Dropout(eval)=identity] * n_hlayers, then
        #     the output Linear.  Accumulate in f32; keep h in compute_dtype between layers.
        for i in range(n_layers):
            acc = jnp.dot(h, w_refs[i][...], preferred_element_type=jnp.float32)
            acc = acc + b_refs[i][...].astype(jnp.float32)
            if i < n_layers - 1:
                h = jnp.maximum(acc, 0.0).astype(compute_dtype)
            else:
                h = acc

        out_ref[...] = h.astype(out_ref.dtype)

    return kernel


def wrapped_decoder_forward(embeddings, params, *, output_dim, max_tile_b=2048,
                            use_bf16_matmul=False, n_batch_splits=None):
    """params = [(w0, b0), ..., (w_out, b_out)]; w_i is [in, out], b_i is [1, out] or [out]."""
    B, latent_dim = embeddings.shape
    n_layers = len(params)
    if n_batch_splits is None:
        n_batch_splits = _default_n_splits()

    compute_dtype = jnp.bfloat16 if use_bf16_matmul else jnp.float32
    ws = [w.astype(compute_dtype) for w, _ in params]                 # natural shapes
    bs = [b.reshape(1, -1).astype(jnp.float32) for _, b in params]

    # Batch tiling sized to the actual batch: 1 grid step (2 equal steps on v7x),
    # sublane-aligned; only row padding, never lane padding.
    tb = max(8, min(max_tile_b, _round_up(pl.cdiv(B, n_batch_splits), 8)))
    B_pad = _round_up(B, tb)
    x = embeddings.astype(jnp.float32)
    if B_pad != B:
        x = jnp.pad(x, ((0, B_pad - B), (0, 0)))

    grid = (B_pad // tb,)
    kernel = _make_decoder_kernel(n_layers, compute_dtype)

    itemsize = 2 if use_bf16_matmul else 4
    cost = pl.CostEstimate(
        flops=2 * B_pad * sum(w.shape[0] * w.shape[1] for w, _ in params),
        transcendentals=2 * B_pad,                                    # sqrt + log per row
        bytes_accessed=(B_pad * latent_dim * 4                        # input rows
                        + sum(int(w.size) for w, _ in params) * itemsize
                        + sum(int(b.size) for _, b in params) * 4
                        + B_pad * output_dim * 4))                    # output rows

    in_specs = [pl.BlockSpec((tb, latent_dim), lambda i: (i, 0))]     # streamed activations
    # Weights / biases: full-array blocks with constant index_map -> VMEM-resident.
    in_specs += [pl.BlockSpec(w.shape, lambda i: (0, 0)) for w in ws]
    in_specs += [pl.BlockSpec(b.shape, lambda i: (0, 0)) for b in bs]

    out = pl.pallas_call(
        kernel,
        grid=grid,
        in_specs=in_specs,
        out_specs=pl.BlockSpec((tb, output_dim), lambda i: (i, 0)),
        out_shape=jax.ShapeDtypeStruct((B_pad, output_dim), jnp.float32),
        compiler_params=pltpu.CompilerParams(
            dimension_semantics=("parallel",),
        ),
        cost_estimate=cost,
    )(x, *ws, *bs)

    return out[:B] if B_pad != B else out


def init_linear(key, in_dim, out_dim):
    """Deterministic PyTorch-style nn.Linear init: U(-1/sqrt(in), 1/sqrt(in))."""
    kw, kb = jax.random.split(key)
    bound = 1.0 / jnp.sqrt(jnp.float32(in_dim))
    w = jax.random.uniform(kw, (in_dim, out_dim), jnp.float32, -bound, bound)
    b = jax.random.uniform(kb, (1, out_dim), jnp.float32, -bound, bound)
    return w, b


def reference_forward(embeddings, params, matmul_dtype=jnp.float32):
    """Pure-JAX reference of the same forward pass (optionally mirroring bf16 matmuls)."""
    x = embeddings.astype(jnp.float32)
    norm = jnp.sqrt(jnp.sum(x * x, axis=-1, keepdims=True) + 1e-15)
    norm_c = jnp.clip(norm, 1e-7, 1.0 - 1e-5)
    h = x * (jnp.arctanh(norm_c) / norm_c)
    for i, (w, b) in enumerate(params):
        h = jnp.dot(h.astype(matmul_dtype), w.astype(matmul_dtype),
                    preferred_element_type=jnp.float32) + b.astype(jnp.float32)
        if i < len(params) - 1:
            h = jnp.maximum(h, 0.0)
    return h


if __name__ == "__main__":
    # Module hyperparameters (small, consistent with the forward pass)
    latent_dim = 16
    output_dim = 16
    n_hlayers = 2
    hlayer_size = 32

    key = jax.random.PRNGKey(0)
    k_emb_small, k_emb_big, k_params = jax.random.split(key, 3)

    # Parameters: n_hlayers hidden Linear layers + output Linear layer.
    dims = [latent_dim] + [hlayer_size] * n_hlayers + [output_dim]
    keys = jax.random.split(k_params, len(dims) - 1)
    params = [init_linear(keys[i], dims[i], dims[i + 1]) for i in range(len(dims) - 1)]

    def make_embeddings(k, batch):
        # Embeddings live on the Poincare ball: map tangent vectors through expmap0.
        v = 0.5 * jax.random.normal(k, (batch, latent_dim), jnp.float32)
        v_norm = jnp.sqrt(jnp.sum(v * v, axis=-1, keepdims=True) + 1e-15)
        return jnp.tanh(v_norm) * v / v_norm            # ||embeddings|| < 1

    # --- small batch, exact f32-matmul path (default; matches nn.Linear semantics) -----
    emb_small = make_embeddings(k_emb_small, 8)
    fwd_f32 = jax.jit(functools.partial(
        wrapped_decoder_forward, output_dim=output_dim, use_bf16_matmul=False))
    out_small = jax.block_until_ready(fwd_f32(emb_small, params))
    ref_small = reference_forward(emb_small, params)
    assert out_small.shape == (8, output_dim)
    assert jnp.allclose(out_small, ref_small, atol=1e-4, rtol=1e-4), (
        float(jnp.max(jnp.abs(out_small - ref_small))))

    # --- larger batch: batch-sized tile (B=300 -> 304 rows) + optional bf16 MXU operands
    emb_big = make_embeddings(k_emb_big, 300)            # non-multiple of 8 -> row-pad path
    fwd_bf16 = jax.jit(functools.partial(
        wrapped_decoder_forward, output_dim=output_dim, use_bf16_matmul=True))
    out_big = jax.block_until_ready(fwd_bf16(emb_big, params))
    ref_big = reference_forward(emb_big, params, matmul_dtype=jnp.bfloat16)
    assert out_big.shape == (300, output_dim)
    assert jnp.allclose(out_big, ref_big, atol=5e-3, rtol=5e-3), (
        float(jnp.max(jnp.abs(out_big - ref_big))))

    print("KERNEL_OK")
</pallas_src>

<mosaic_0001>
module attributes {stable_mosaic.version = 11 : i64} {
  func.func @kernel(%arg0: i32, %arg1: memref<8x16xf32, #tpu.memory_space<vmem>>, %arg2: memref<16x32xf32, #tpu.memory_space<vmem>>, %arg3: memref<32x32xf32, #tpu.memory_space<vmem>>, %arg4: memref<32x16xf32, #tpu.memory_space<vmem>>, %arg5: memref<1x32xf32, #tpu.memory_space<vmem>>, %arg6: memref<1x32xf32, #tpu.memory_space<vmem>>, %arg7: memref<1x16xf32, #tpu.memory_space<vmem>>, %arg8: memref<8x16xf32, #tpu.memory_space<vmem>>) attributes {dimension_semantics = [#tpu.dimension_semantics<parallel>], iteration_bounds = array<i64: 1>, scalar_prefetch = 0 : i64, scratch_operands = 0 : i64, tpu.core_type = #tpu.core_type<tc>, window_params = [{transform_indices = @transform_0, window_bounds = array<i64: 8, 16>}, {pipeline_mode = #tpu.pipeline_mode<synchronous>, transform_indices = @transform_1, window_bounds = array<i64: 16, 32>}, {pipeline_mode = #tpu.pipeline_mode<synchronous>, transform_indices = @transform_2, window_bounds = array<i64: 32, 32>}, {pipeline_mode = #tpu.pipeline_mode<synchronous>, transform_indices = @transform_3, window_bounds = array<i64: 32, 16>}, {pipeline_mode = #tpu.pipeline_mode<synchronous>, transform_indices = @transform_4, window_bounds = array<i64: 1, 32>}, {pipeline_mode = #tpu.pipeline_mode<synchronous>, transform_indices = @transform_5, window_bounds = array<i64: 1, 32>}, {pipeline_mode = #tpu.pipeline_mode<synchronous>, transform_indices = @transform_6, window_bounds = array<i64: 1, 16>}, {transform_indices = @transform_7, window_bounds = array<i64: 8, 16>}]} {
    %c0 = arith.constant 0 : index
    %c0_0 = arith.constant 0 : index
    %0 = vector.load %arg1[%c0, %c0_0] : memref<8x16xf32, #tpu.memory_space<vmem>>, vector<8x16xf32>
    %1 = arith.mulf %0, %0 : vector<8x16xf32>
    %cst = arith.constant dense<0.000000e+00> : vector<8xf32>
    %2 = vector.multi_reduction <add>, %1, %cst [1] : vector<8x16xf32> to vector<8xf32>
    %3 = vector.shape_cast %2 : vector<8xf32> to vector<8x1xf32>
    %cst_1 = arith.constant 1.000000e-15 : f32
    %4 = vector.broadcast %cst_1 : f32 to vector<8x1xf32>
    %5 = arith.addf %3, %4 : vector<8x1xf32>
    %6 = math.sqrt %5 : vector<8x1xf32>
    %cst_2 = arith.constant 1.000000e-07 : f32
    %cst_3 = arith.constant 0.999989986 : f32
    %7 = vector.broadcast %cst_2 : f32 to vector<8x1xf32>
    %8 = arith.maximumf %7, %6 : vector<8x1xf32>
    %9 = vector.broadcast %cst_3 : f32 to vector<8x1xf32>
    %10 = arith.minimumf %9, %8 : vector<8x1xf32>
    %cst_4 = arith.constant 1.000000e+00 : f32
    %11 = vector.broadcast %cst_4 : f32 to vector<8x1xf32>
    %12 = arith.addf %11, %10 : vector<8x1xf32>
    %cst_5 = arith.constant 1.000000e+00 : f32
    %13 = vector.broadcast %cst_5 : f32 to vector<8x1xf32>
    %14 = arith.subf %13, %10 : vector<8x1xf32>
    %15 = tpu.reciprocal %14 : vector<8x1xf32> -> vector<8x1xf32>
    %16 = arith.mulf %12, %15 : vector<8x1xf32>
    %17 = math.log %16 : vector<8x1xf32>
    %cst_6 = arith.constant 5.000000e-01 : f32
    %18 = vector.broadcast %cst_6 : f32 to vector<8x1xf32>
    %19 = arith.mulf %18, %17 : vector<8x1xf32>
    %20 = tpu.reciprocal %10 : vector<8x1xf32> -> vector<8x1xf32>
    %21 = arith.mulf %19, %20 : vector<8x1xf32>
    %22 = vector.broadcast %21 : vector<8x1xf32> to vector<8x16xf32>
    %23 = arith.mulf %0, %22 : vector<8x16xf32>
    %c0_7 = arith.constant 0 : index
    %c0_8 = arith.constant 0 : index
    %24 = vector.load %arg2[%c0_7, %c0_8] : memref<16x32xf32, #tpu.memory_space<vmem>>, vector<16x32xf32>
    %cst_9 = arith.constant dense<0.000000e+00> : vector<8x32xf32>
    %25 = tpu.matmul %23, %24, %cst_9 {dimension_numbers = #tpu.dot_dimension_numbers<[1], [0], [0], [1], [0, 0, 1, 1], [], []>} : vector<8x16xf32>, vector<16x32xf32>, vector<8x32xf32> -> vector<8x32xf32>
    %c0_10 = arith.constant 0 : index
    %c0_11 = arith.constant 0 : index
    %26 = vector.load %arg5[%c0_10, %c0_11] : memref<1x32xf32, #tpu.memory_space<vmem>>, vector<1x32xf32>
    %27 = vector.broadcast %26 : vector<1x32xf32> to vector<8x32xf32>
    %28 = arith.addf %25, %27 : vector<8x32xf32>
    %cst_12 = arith.constant 0.000000e+00 : f32
    %29 = vector.broadcast %cst_12 : f32 to vector<8x32xf32>
    %30 = arith.maximumf %28, %29 : vector<8x32xf32>
    %c0_13 = arith.constant 0 : index
    %c0_14 = arith.constant 0 : index
    %31 = vector.load %arg3[%c0_13, %c0_14] : memref<32x32xf32, #tpu.memory_space<vmem>>, vector<32x32xf32>
    %cst_15 = arith.constant dense<0.000000e+00> : vector<8x32xf32>
    %32 = tpu.matmul %30, %31, %cst_15 {dimension_numbers = #tpu.dot_dimension_numbers<[1], [0], [0], [1], [0, 0, 1, 1], [], []>} : vector<8x32xf32>, vector<32x32xf32>, vector<8x32xf32> -> vector<8x32xf32>
    %c0_16 = arith.constant 0 : index
    %c0_17 = arith.constant 0 : index
    %33 = vector.load %arg6[%c0_16, %c0_17] : memref<1x32xf32, #tpu.memory_space<vmem>>, vector<1x32xf32>
    %34 = vector.broadcast %33 : vector<1x32xf32> to vector<8x32xf32>
    %35 = arith.addf %32, %34 : vector<8x32xf32>
    %cst_18 = arith.constant 0.000000e+00 : f32
    %36 = vector.broadcast %cst_18 : f32 to vector<8x32xf32>
    %37 = arith.maximumf %35, %36 : vector<8x32xf32>
    %c0_19 = arith.constant 0 : index
    %c0_20 = arith.constant 0 : index
    %38 = vector.load %arg4[%c0_19, %c0_20] : memref<32x16xf32, #tpu.memory_space<vmem>>, vector<32x16xf32>
    %cst_21 = arith.constant dense<0.000000e+00> : vector<8x16xf32>
    %39 = tpu.matmul %37, %38, %cst_21 {dimension_numbers = #tpu.dot_dimension_numbers<[1], [0], [0], [1], [0, 0, 1, 1], [], []>} : vector<8x32xf32>, vector<32x16xf32>, vector<8x16xf32> -> vector<8x16xf32>
    %c0_22 = arith.constant 0 : index
    %c0_23 = arith.constant 0 : index
    %40 = vector.load %arg7[%c0_22, %c0_23] : memref<1x16xf32, #tpu.memory_space<vmem>>, vector<1x16xf32>
    %41 = vector.broadcast %40 : vector<1x16xf32> to vector<8x16xf32>
    %42 = arith.addf %39, %41 : vector<8x16xf32>
    %c0_24 = arith.constant 0 : index
    %c0_25 = arith.constant 0 : index
    %43 = vector.load %arg8[%c0_24, %c0_25] : memref<8x16xf32, #tpu.memory_space<vmem>>, vector<8x16xf32>
    tpu.vector_store %arg8[%c0_24, %c0_25], %42 {strides = array<i32>} : memref<8x16xf32, #tpu.memory_space<vmem>>, vector<8x16xf32>,
    return
  }
  func.func @transform_0(%arg0: i32) -> (i32, i32) {
    %c0_i32 = arith.constant 0 : i32
    %c0_i32_0 = arith.constant 0 : i32
    return %arg0, %c0_i32 : i32, i32
  }
  func.func @transform_1(%arg0: i32) -> (i32, i32) {
    %c0_i32 = arith.constant 0 : i32
    %c0_i32_0 = arith.constant 0 : i32
    %c0_i32_1 = arith.constant 0 : i32
    return %c0_i32, %c0_i32_0 : i32, i32
  }
  func.func @transform_2(%arg0: i32) -> (i32, i32) {
    %c0_i32 = arith.constant 0 : i32
    %c0_i32_0 = arith.constant 0 : i32
    %c0_i32_1 = arith.constant 0 : i32
    return %c0_i32, %c0_i32_0 : i32, i32
  }
  func.func @transform_3(%arg0: i32) -> (i32, i32) {
    %c0_i32 = arith.constant 0 : i32
    %c0_i32_0 = arith.constant 0 : i32
    %c0_i32_1 = arith.constant 0 : i32
    return %c0_i32, %c0_i32_0 : i32, i32
  }
  func.func @transform_4(%arg0: i32) -> (i32, i32) {
    %c0_i32 = arith.constant 0 : i32
    %c0_i32_0 = arith.constant 0 : i32
    %c0_i32_1 = arith.constant 0 : i32
    return %c0_i32, %c0_i32_0 : i32, i32
  }
  func.func @transform_5(%arg0: i32) -> (i32, i32) {
    %c0_i32 = arith.constant 0 : i32
    %c0_i32_0 = arith.constant 0 : i32
    %c0_i32_1 = arith.constant 0 : i32
    return %c0_i32, %c0_i32_0 : i32, i32
  }
  func.func @transform_6(%arg0: i32) -> (i32, i32) {
    %c0_i32 = arith.constant 0 : i32
    %c0_i32_0 = arith.constant 0 : i32
    %c0_i32_1 = arith.constant 0 : i32
    return %c0_i32, %c0_i32_0 : i32, i32
  }
  func.func @transform_7(%arg0: i32) -> (i32, i32) {
    %c0_i32 = arith.constant 0 : i32
    %c0_i32_0 = arith.constant 0 : i32
    return %arg0, %c0_i32 : i32, i32
  }
}

</mosaic_0001>

<bundles_post_ra>
// kernel: wrapped_decoder_forward.1
= control target key start
LH: loop header
LB: loop body
LE: loop exit
PB: predicated region body
PF: predicated region fallthrough
CT: control target
= control target key end

     0   :  { %12 = vsyncpa [#allocation3], 0  ;;  %s572_s0 = inlined_call_operand.hbm [shape: f32[8,16], index: 0, kind: input, shape index: {}]   ;;  %s573_s1 = inlined_call_operand.vmem [shape: f32[16,32], index: 1, kind: input, shape index: {}]   ;;  %s574_s2 = inlined_call_operand.vmem [shape: f32[32,32], index: 2, kind: input, shape index: {}]   ;;  %s575_s3 = inlined_call_operand.vmem [shape: f32[32,16], index: 3, kind: input, shape index: {}]   ;;  %s576_s4 = inlined_call_operand.vmem [shape: f32[1,32], index: 4, kind: input, shape index: {}]   ;;  %s577_s5 = inlined_call_operand.vmem [shape: f32[1,32], index: 5, kind: input, shape index: {}]   ;;  %s578_s6 = inlined_call_operand.vmem [shape: f32[1,16], index: 6, kind: input, shape index: {}]   ;;  %s579_s7 = inlined_call_operand.hbm [shape: f32[8,16], index: 7, kind: output, shape index: {}]  }
   0x1   :  { %13 = vsyncpa [#allocation4], 0  ;;  %s458_s24 = smov [#allocation2]   ;;  %s410_s28 = scalar_lea.hbm %s572_s0, 128 }
   0x2   :  { %s20_s25 = sshll.u32 %s458_s24, 4  ;;  %p411_p0 = scmp.ne.s32.totalorder %s572_s0, %s410_s28  ;;  %s21_s25 = int_to_ptr.vmem [resolvable:$true] %s20_s25 }
   0x3   :  { %p414_p1 = scmp.lt.u32.totalorder %s410_s28, %s572_s0 }
   0x5   :  { %p416_p2 = pnand %p414_p1, %p411_p0 }
   0x7   :  { %419 = shalt.err (!%p416_p2)
}
   0x8   :  { %s420_s10 = scalar_lea.vmem %s21_s25, 128  ;;  %p425_p4 = scmp.lt.s32.totalorder %s21_s25, %s21_s25 }
   0x9   :  { %p421_p3 = scmp.ne.s32.totalorder %s21_s25, %s420_s10  ;;  %p426_p5 = scmp.lt.s32.totalorder %s420_s10, %s420_s10 }
   0xb   :  { %p427_p6 = por %p426_p5, %p425_p4 }
   0xd   :  { %p428_p7 = pnand %p427_p6, %p421_p3 }
   0xf   :  { %431 = shalt.err (!%p428_p7)
}
  0x10   :  { %23 = dma.hbm_to_vmem [thread:$0]  %s572_s0, 128, %s21_s25, [#allocation3]  }
  0x11   :  { %454 = dma.done.wait [#allocation3], 128  }
  0x12   :  { %455 = vsyncadd [#allocation3], 4294967168  ;;  %v39_v0 = vld [vmem:[#allocation2] sm:$0xff]  ;;  %vm41_vm0 = vcmask 130048   ;;  %v66_v4 = vld [vmem:[%s573_s1 + $0x8] sm:$0xff]  ;;  %v459_v5 = vmov 0.0|0.0  }
  0x13   :  { %v40_v1 = vmul.f32 %v39_v0, %v39_v0  ;;  %v65_v3 = vld [vmem:[%s573_s1] sm:$0xff]  ;;  %382 = vmatprep.subr.bf16.mxu0 %v459_v5  ;;  %vm460_vm1 = vmmov 0   ;;  %v461_v7 = vmov 0.0   ;;  %385 = vmatprep.subr.bf16.mxu1 %v459_v5  ;;  %v149_v9 = vld [vmem:[%s574_s2 + $0x8] sm:$0xff]  ;;  %v150_v30 = vld [vmem:[%s574_s2 + $0x10] sm:$0xff]  ;;  %vm159_vm4 = vcmask 261120  }
  0x14   :  { %v383_v6 = vpack.c.bf16 %v66_v4, %v65_v3  ;;  %357 = vmatprep.mubr.msk.f32.mxu0 %vm460_vm1, %v461_v7  ;;  %368 = vmatprep.mubr.msk.f32.mxu1 %vm460_vm1, %v461_v7  ;;  %v148_v8 = vld [vmem:[%s574_s2] sm:$0xff]  ;;  %v151_v31 = vld [vmem:[%s574_s2 + $0x18] sm:$0xff]  ;;  %v235_v34 = vld [vmem:[%s575_s3 + $0x8] sm:$0xff]  ;;  %s462_s12 = smov [#allocation5]  }
  0x15   :  { %v42_v2 = vsel %vm41_vm0, %v40_v1, 0.0  ;;  %v386_v10 = vpack.c.bf16 %v149_v9, %v148_v8  ;;  %v389_v32 = vpack.c.bf16 %v151_v31, %v150_v30  ;;  %v234_v33 = vld [vmem:[%s575_s3] sm:$0xff]  ;;  %v236_v41 = vld [vmem:[%s575_s3 + $0x10] sm:$0xff]  ;;  %v237_v42 = vld [vmem:[%s575_s3 + $0x18] sm:$0xff]  ;;  %s325_s13 = sshll.u32 %s462_s12, 4  ;;  %s326_s13 = int_to_ptr.vmem [resolvable:$true] %s325_s13 }
  0x16   :  { %43 = vadd.xlane.f32.xlu0 %v42_v2  ;;  %384 = vmatpush3.bf16.msra.mxu0 %v383_v6  ;;  %v392_v35 = vpack.c.bf16 %v235_v34, %v234_v33  ;;  %v334_v36 = vld [vmem:[%s576_s4] ss:$0 sm:$0xff]  ;;  %v395_v43 = vpack.c.bf16 %v237_v42, %v236_v41  ;;  %s432_s3 = scalar_lea.vmem %s326_s13, 128  ;;  %p437_p9 = scmp.lt.s32.totalorder %s326_s13, %s326_s13 }
  0x17   :  { %391 = vmatprep.subr.bf16.mxu0 %v459_v5  ;;  %387 = vmatpush3.bf16.msra.mxu1 %v386_v10  ;;  %v336_v44 = vld [vmem:[%s577_s5] ss:$0 sm:$0xff]  ;;  %p433_p8 = scmp.ne.s32.totalorder %s326_s13, %s432_s3  ;;  %p438_p10 = scmp.lt.s32.totalorder %s432_s3, %s432_s3 }
  0x18   :  { %388 = vmatprep.subr.bf16.mxu1 %v459_v5  ;;  %v338_v49 = vld [vmem:[%s578_s6] ss:$0 sm:$0xff] }
  0x19   :  { %p439_p11 = por %p438_p10, %p437_p9 }
  0x1b   :  { %390 = vmatpush3.bf16.msra.mxu1 %v389_v32  ;;  %p440_p12 = pnand %p439_p11, %p433_p8 }
  0xa3   :  { %v44_v11 = vpop.xlane.xlu0 %43 }
  0xa4   :  { %v45_v12 = vadd.f32 1e-15, %v44_v11 }
  0xa6   :  { %402 = vrsqrt.f32 %v45_v12  ;;  %vm48_vm2 = vcmp.eq.f32.partialorder %v45_v12, inf  ;;  %v51_v15 = vand.u32 2147483648, %v45_v12  ;;  %vm50_vm3 = vcmp.eq.f32.partialorder %v45_v12, 0.0 }
  0xb0   :  { %v403_v13 = vpop.eup %402 }
  0xb1   :  { %v47_v14 = vmul.f32 %v403_v13, %v45_v12 }
  0xb3   :  { %v49_v16 = vsel %vm48_vm2, %v45_v12, %v47_v14 }
  0xb4   :  { %v52_v17 = vsel %vm50_vm3, %v51_v15, %v49_v16 }
  0xb5   :  { %v53_v18 = vmax.f32 %v52_v17, 1e-07 }
  0xb7   :  { %v54_v19 = vmin.f32 %v53_v18, 0.99999 }
  0xb9   :  { %v56_v20 = vsub.f32 1.0, %v54_v19  ;;  %v55_v21 = vadd.f32 1.0, %v54_v19 }
  0xbb   :  { %404 = vrcp.f32 %v56_v20 }
  0xc5   :  { %v405_v22 = vpop.eup %404 }
  0xc6   :  { %v58_v23 = vmul.f32 %v405_v22, %v55_v21 }
  0xc8   :  { %406 = vlog2.f32 %v58_v23 }
  0xc9   :  { %408 = vrcp.f32 %v54_v19 }
  0xd2   :  { %v407_v24 = vpop.eup %406 }
  0xd3   :  { %v60_v25 = vmul.f32 0.6931472, %v407_v24  ;;  %v409_v27 = vpop.eup %408 }
  0xd5   :  { %v61_v26 = vmul.f32 0.5, %v60_v25 }
  0xd7   :  { %v63_v28 = vmul.f32 %v409_v27, %v61_v26 }
  0xd9   :  { %v64_v29 = vmul.f32 %v63_v28, %v39_v0 }
  0xdb   :  { %358 = vmatmul.mubr.msk.f32.vlgmr.msra.gmra.mrb[0].mxu0 %vm41_vm0, %v64_v29 }
  0xdc   :  { %379 = vmatprep.mubr.msk.f32.mxu0 %vm460_vm1, %v461_v7  ;;  %393 = vmatpush3.bf16.msra.mxu0 %v392_v35 }
  0xdd   :  { %394 = vmatprep.subr.bf16.mxu0 %v459_v5 }
  0xe0   :  { %396 = vmatpush3.bf16.msra.mxu0 %v395_v43 }
 0x1ae   :  { %v143_v37 = vpop.f32.mrb[0].mxu0 }
 0x1af   :  { %v144_v38 = vadd.f32 %v334_v36, %v143_v37  ;;  %v359_v39 = vpop.f32.mrb[1].mxu0 }
 0x1b1   :  { %v147_v40 = vmax.f32 %v144_v38, 0.0 }
 0x1b3   :  { %369 = vmatmul.mubr.msk.f32.vlgmr.msra.gmra.mrb[0].mxu1 %vm159_vm4, %v147_v40 }
 0x286   :  { %v229_v45 = vpop.f32.mrb[0].mxu1 }
 0x287   :  { %v230_v46 = vadd.f32 %v336_v44, %v229_v45  ;;  %v370_v47 = vpop.f32.mrb[1].mxu1 }
 0x289   :  { %v233_v48 = vmax.f32 %v230_v46, 0.0 }
 0x28b   :  { %380 = vmatmul.mubr.msk.f32.vlgmr.msra.gmra.mrb[2].mxu0 %vm159_vm4, %v233_v48 }
 0x35e   :  { %v314_v50 = vpop.f32.mrb[2].mxu0 }
 0x35f   :  { %v315_v51 = vadd.f32 %v338_v49, %v314_v50  ;;  %v381_v52 = vpop.f32.mrb[3].mxu0 }
 0x361   :  { %318 = vst.msk [vmem:[#allocation5] sm:$0xff] %vm41_vm0, %v315_v51 }
 0x362   :  { %443 = shalt.err (!%p440_p12)
}
 0x363   :  { %s444_s15 = scalar_lea.hbm %s579_s7, 128 }
 0x364   :  { %p445_p13 = scmp.ne.s32.totalorder %s579_s7, %s444_s15  ;;  %p448_p0 = scmp.lt.u32.totalorder %s444_s15, %s579_s7 }
 0x366   :  { %p450_p1 = pnand %p448_p0, %p445_p13 }
 0x368   :  { %453 = shalt.err (!%p450_p1)
}
 0x369   :  { %328 = dma.vmem_to_hbm [thread:$0]  %s326_s13, 128, %s579_s7, [#allocation4]  }
 0x36a   :  { %456 = dma.done.wait [#allocation4], 128  }
 0x36b   :  { %457 = vsyncadd [#allocation4], 4294967168 }
 0x36c   :  { %332 = vsyncpa [#allocation3], 1 }
 0x36d   :  { %333 = vsyncpa [#allocation4], 1 }

</bundles_post_ra>
